<compile_context>
chip_gen: v6e
topology: v6e:2x2x1
jax: 0.10.0
libtpu: 0.0.40
codegen_flags: <defaults>
</compile_context>

<pallas_src>
import jax
import jax.numpy as jnp
from jax.experimental import pallas as pl
from jax.experimental.pallas import tpu as pltpu  # noqa: F401  (kept for parity)


def mlp_kernel(x_ref, w1_ref, b1_ref, w2_ref, b2_ref, out_ref):
    # x_ref:  [B, N*D] bf16      w1_ref: [N*D, H] bf16   b1_ref: [1, H] f32
    # w2_ref: [H, NL]  bf16      b2_ref: [1, NL]  f32    out_ref:[B, NL] f32
    h = jnp.dot(x_ref[...], w1_ref[...],
                preferred_element_type=jnp.float32) + b1_ref[...]
    h = jnp.maximum(h, 0.0)                                    # ReLU (f32)

    logits = jnp.dot(h.astype(jnp.bfloat16), w2_ref[...],
                     preferred_element_type=jnp.float32) + b2_ref[...]

    # Numerically-stable softmax over labels (exact divide so rows sum to 1).
    m = jnp.max(logits, axis=-1, keepdims=True)
    e = jnp.exp(logits - m)
    s = jnp.sum(e, axis=-1, keepdims=True)
    out_ref[...] = e / s


def mlp_forward(x, params):
    """x: [B, N, D]  (== torch.stack(embedding)); returns labels [B, num_labels]."""
    B, N, D = x.shape
    w1, b1, w2, b2 = params
    NL = w2.shape[1]
    # Host-side glue: PyTorch's .view(B, -1) row-major flatten, bf16 for the MXU.
    x_flat = x.reshape(B, N * D).astype(jnp.bfloat16)
    # Whole problem fits in VMEM trivially -> single grid step, full arrays.
    return pl.pallas_call(
        mlp_kernel,
        out_shape=jax.ShapeDtypeStruct((B, NL), jnp.float32),
    )(x_flat, w1, b1, w2, b2)


def init_params(key, N, D, H, NL):
    """Deterministic parameters in PyTorch shapes, plus kernel-friendly layouts."""
    k1, k1b, k2, k2b = jax.random.split(key, 4)
    ND = N * D
    # PyTorch-shaped parameters (f32).
    w1_pt = jax.random.uniform(k1, (H, ND), jnp.float32, -0.1, 0.1)
    b1_pt = jax.random.uniform(k1b, (H,), jnp.float32, -0.1, 0.1)
    w2_pt = jax.random.uniform(k2, (NL, H), jnp.float32, -0.1, 0.1)
    b2_pt = jax.random.uniform(k2b, (NL,), jnp.float32, -0.1, 0.1)
    # Kernel layouts: transposed for right-multiplication, weights in bf16,
    # biases as (1, *) f32 rows.
    w1 = jnp.transpose(w1_pt).astype(jnp.bfloat16)   # [ND, H]
    b1 = b1_pt[None, :]                              # [1, H] f32
    w2 = jnp.transpose(w2_pt).astype(jnp.bfloat16)   # [H, NL]
    b2 = b2_pt[None, :]                              # [1, NL] f32
    kparams = (w1, b1, w2, b2)
    ptparams = (w1_pt, b1_pt, w2_pt, b2_pt)
    return kparams, ptparams


def reference_forward(x, pt_params):
    """Plain-JAX replica of the PyTorch MLP forward (eval mode)."""
    w1, b1, w2, b2 = pt_params
    B = x.shape[0]
    flat = x.reshape(B, -1)                          # .view(B, -1)
    h = jax.nn.relu(flat @ w1.T + b1)                # Linear + ReLU (Dropout = id)
    logits = h @ w2.T + b2                           # Linear
    return jax.nn.softmax(logits, axis=1)


if __name__ == "__main__":
    # Small config: max_length=16, embedding_size=32, hidden_size=32, num_labels=4.
    B, N, D = 2, 16, 32
    H, NL = 32, 4

    key = jax.random.PRNGKey(0)
    kx, kp = jax.random.split(key)
    x = jax.random.normal(kx, (B, N, D), dtype=jnp.float32)  # stacked embeddings
    kparams, ptparams = init_params(kp, N, D, H, NL)

    labels = jax.block_until_ready(mlp_forward(x, kparams))
    assert labels.shape == (B, NL)

    ref = reference_forward(x, ptparams)
    # bf16 matmul operands (f32 accumulation) -> loosened tolerance vs f32 ref.
    if not jnp.allclose(labels, ref, atol=2e-2, rtol=2e-2):
        raise AssertionError(f"mismatch vs reference:\n{labels}\n{ref}")
    # Rows must be valid probability distributions (exact divide -> tight sum).
    if not jnp.allclose(jnp.sum(labels, axis=-1), 1.0, atol=1e-3):
        raise AssertionError("softmax rows do not sum to 1")

    print("KERNEL_OK")
</pallas_src>

<mosaic_0001>
module attributes {stable_mosaic.version = 11 : i64} {
  func.func @mlp_kernel(%arg0: memref<2x512xbf16, #tpu.memory_space<vmem>>, %arg1: memref<512x32xbf16, #tpu.memory_space<vmem>>, %arg2: memref<1x32xf32, #tpu.memory_space<vmem>>, %arg3: memref<32x4xbf16, #tpu.memory_space<vmem>>, %arg4: memref<1x4xf32, #tpu.memory_space<vmem>>, %arg5: memref<2x4xf32, #tpu.memory_space<vmem>>) attributes {dimension_semantics = [], scalar_prefetch = 0 : i64, scratch_operands = 0 : i64, tpu.core_type = #tpu.core_type<tc>} {
    %c0 = arith.constant 0 : index
    %c0_0 = arith.constant 0 : index
    %0 = vector.load %arg0[%c0, %c0_0] : memref<2x512xbf16, #tpu.memory_space<vmem>>, vector<2x512xbf16>
    %c0_1 = arith.constant 0 : index
    %c0_2 = arith.constant 0 : index
    %1 = vector.load %arg1[%c0_1, %c0_2] : memref<512x32xbf16, #tpu.memory_space<vmem>>, vector<512x32xbf16>
    %cst = arith.constant dense<0.000000e+00> : vector<2x32xf32>
    %2 = tpu.matmul %0, %1, %cst {dimension_numbers = #tpu.dot_dimension_numbers<[1], [0], [0], [1], [0, 0, 1, 1], [], []>} : vector<2x512xbf16>, vector<512x32xbf16>, vector<2x32xf32> -> vector<2x32xf32>
    %c0_3 = arith.constant 0 : index
    %c0_4 = arith.constant 0 : index
    %3 = vector.load %arg2[%c0_3, %c0_4] : memref<1x32xf32, #tpu.memory_space<vmem>>, vector<1x32xf32>
    %4 = vector.broadcast %3 : vector<1x32xf32> to vector<2x32xf32>
    %5 = arith.addf %2, %4 : vector<2x32xf32>
    %cst_5 = arith.constant 0.000000e+00 : f32
    %6 = vector.broadcast %cst_5 : f32 to vector<2x32xf32>
    %7 = arith.maximumf %5, %6 : vector<2x32xf32>
    %8 = arith.truncf %7 : vector<2x32xf32> to vector<2x32xbf16>
    %c0_6 = arith.constant 0 : index
    %c0_7 = arith.constant 0 : index
    %9 = vector.load %arg3[%c0_6, %c0_7] : memref<32x4xbf16, #tpu.memory_space<vmem>>, vector<32x4xbf16>
    %cst_8 = arith.constant dense<0.000000e+00> : vector<2x4xf32>
    %10 = tpu.matmul %8, %9, %cst_8 {dimension_numbers = #tpu.dot_dimension_numbers<[1], [0], [0], [1], [0, 0, 1, 1], [], []>} : vector<2x32xbf16>, vector<32x4xbf16>, vector<2x4xf32> -> vector<2x4xf32>
    %c0_9 = arith.constant 0 : index
    %c0_10 = arith.constant 0 : index
    %11 = vector.load %arg4[%c0_9, %c0_10] : memref<1x4xf32, #tpu.memory_space<vmem>>, vector<1x4xf32>
    %12 = vector.broadcast %11 : vector<1x4xf32> to vector<2x4xf32>
    %13 = arith.addf %10, %12 : vector<2x4xf32>
    %cst_11 = arith.constant dense<0xFF800000> : vector<2xf32>
    %14 = vector.multi_reduction <maximumf>, %13, %cst_11 [1] : vector<2x4xf32> to vector<2xf32>
    %15 = vector.shape_cast %14 : vector<2xf32> to vector<2x1xf32>
    %16 = vector.broadcast %15 : vector<2x1xf32> to vector<2x4xf32>
    %17 = arith.subf %13, %16 : vector<2x4xf32>
    %18 = math.exp %17 : vector<2x4xf32>
    %cst_12 = arith.constant dense<0.000000e+00> : vector<2xf32>
    %19 = vector.multi_reduction <add>, %18, %cst_12 [1] : vector<2x4xf32> to vector<2xf32>
    %20 = vector.shape_cast %19 : vector<2xf32> to vector<2x1xf32>
    %21 = vector.broadcast %20 : vector<2x1xf32> to vector<2x4xf32>
    %22 = arith.divf %18, %21 : vector<2x4xf32>
    %c0_13 = arith.constant 0 : index
    %c0_14 = arith.constant 0 : index
    %23 = vector.load %arg5[%c0_13, %c0_14] : memref<2x4xf32, #tpu.memory_space<vmem>>, vector<2x4xf32>
    tpu.vector_store %arg5[%c0_13, %c0_14], %22 {strides = array<i32>} : memref<2x4xf32, #tpu.memory_space<vmem>>, vector<2x4xf32>,
    return
  }
}

</mosaic_0001>

<bundles_post_ra>
// kernel: tpu_custom_call.1
= control target key start
LH: loop header
LB: loop body
LE: loop exit
PB: predicated region body
PF: predicated region fallthrough
CT: control target
= control target key end

     0   :  { %v106_v28 = vlaneseq  ;;  %v648_v35 = vmov 1966171168   ;;  %s799_s0 = inlined_call_operand.vmem [shape: bf16[2,512], index: 0, kind: input, shape index: {}]   ;;  %s800_s1 = inlined_call_operand.vmem [shape: bf16[512,32], index: 1, kind: input, shape index: {}]   ;;  %s801_s2 = inlined_call_operand.vmem [shape: f32[1,32], index: 2, kind: input, shape index: {}]   ;;  %s802_s3 = inlined_call_operand.vmem [shape: bf16[32,4], index: 3, kind: input, shape index: {}]   ;;  %s803_s4 = inlined_call_operand.vmem [shape: f32[1,4], index: 4, kind: input, shape index: {}]   ;;  %s804_s5 = inlined_call_operand.hbm [shape: f32[2,4], index: 5, kind: output, shape index: {}]  }
   0x1   :  { %v588_v0 = vld [vmem:[%s800_s1 + $0x78] sm:$0xff]   ;;  %v592_v4 = vld [vmem:[%s800_s1 + $0x70] sm:$0xff]   ;;  %v596_v8 = vld [vmem:[%s800_s1 + $0x68] sm:$0xff]   ;;  %v104_v36 = vunpack.c.l.s4 %v648_v35 }
   0x2   :  { %v589_v1 = vld [vmem:[%s800_s1 + $0xf8] sm:$0xff]   ;;  %529 = vmatprep.subr.bf16.mxu0 %v588_v0  ;;  %v593_v5 = vld [vmem:[%s800_s1 + $0xf0] sm:$0xff]   ;;  %v597_v9 = vld [vmem:[%s800_s1 + $0xe8] sm:$0xff]   ;;  %v107_v33 = vshrl.u32 %v106_v28, 7 }
   0x3   :  { %v590_v2 = vld [vmem:[%s800_s1 + $0x38] sm:$0xff]   ;;  %551 = vmatprep.subr.bf16.mxu1 %v589_v1  ;;  %v594_v6 = vld [vmem:[%s800_s1 + $0x30] sm:$0xff]   ;;  %v598_v10 = vld [vmem:[%s800_s1 + $0x28] sm:$0xff]  }
   0x4   :  { %v591_v3 = vld [vmem:[%s800_s1 + $0xb8] sm:$0xff]   ;;  %530 = vmatpush3.bf16.msra.mxu0 %v590_v2  ;;  %v595_v7 = vld [vmem:[%s800_s1 + $0xb0] sm:$0xff]   ;;  %v599_v11 = vld [vmem:[%s800_s1 + $0xa8] sm:$0xff]  }
   0x5   :  { %552 = vmatpush3.bf16.msra.mxu1 %v591_v3  ;;  %531 = vmatprep.subr.bf16.mxu0 %v592_v4  ;;  %v600_v12 = vld [vmem:[%s800_s1 + $0x60] sm:$0xff]   ;;  %v604_v16 = vld [vmem:[%s800_s1 + $0x58] sm:$0xff]   ;;  %v608_v20 = vld [vmem:[%s800_s1 + $0x50] sm:$0xff]  }
   0x6   :  { %553 = vmatprep.subr.bf16.mxu1 %v593_v5  ;;  %v601_v13 = vld [vmem:[%s800_s1 + $0xe0] sm:$0xff]   ;;  %v605_v17 = vld [vmem:[%s800_s1 + $0xd8] sm:$0xff]   ;;  %v609_v21 = vld [vmem:[%s800_s1 + $0xd0] sm:$0xff]  }
   0x7   :  { %v602_v14 = vld [vmem:[%s800_s1 + $0x20] sm:$0xff]   ;;  %v606_v18 = vld [vmem:[%s800_s1 + $0x18] sm:$0xff]   ;;  %v610_v22 = vld [vmem:[%s800_s1 + $0x10] sm:$0xff]  }
   0x8   :  { %532 = vmatpush3.bf16.msra.mxu0 %v594_v6  ;;  %v603_v15 = vld [vmem:[%s800_s1 + $0xa0] sm:$0xff]   ;;  %v607_v19 = vld [vmem:[%s800_s1 + $0x98] sm:$0xff]   ;;  %v611_v23 = vld [vmem:[%s800_s1 + $0x90] sm:$0xff]  }
   0x9   :  { %554 = vmatpush3.bf16.msra.mxu1 %v595_v7  ;;  %533 = vmatprep.subr.bf16.mxu0 %v596_v8  ;;  %v612_v24 = vld [vmem:[%s800_s1 + $0x48] sm:$0xff]   ;;  %v616_v29 = vld [vmem:[%s800_s1 + $0x40] sm:$0xff]  }
   0xa   :  { %555 = vmatprep.subr.bf16.mxu1 %v597_v9  ;;  %v613_v25 = vld [vmem:[%s800_s1 + $0xc8] sm:$0xff]   ;;  %v617_v30 = vld [vmem:[%s800_s1 + $0xc0] sm:$0xff]  }
   0xb   :  { %v614_v26 = vld [vmem:[%s800_s1 + $0x8] sm:$0xff]   ;;  %v618_v31 = vld [vmem:[%s800_s1] sm:$0xff]  }
   0xc   :  { %534 = vmatpush3.bf16.msra.mxu0 %v598_v10  ;;  %v615_v27 = vld [vmem:[%s800_s1 + $0x88] sm:$0xff]   ;;  %v619_v32 = vld [vmem:[%s800_s1 + $0x80] sm:$0xff]  }
   0xd   :  { %556 = vmatpush3.bf16.msra.mxu1 %v599_v11  ;;  %535 = vmatprep.subr.bf16.mxu0 %v600_v12  ;;  %v492_v34 = vld.sshfl [vmem:[%s799_s0] sm:$0x33 pattern:$0x75316420] }
   0xe   :  { %557 = vmatprep.subr.bf16.mxu1 %v601_v13 }
  0x10   :  { %536 = vmatpush3.bf16.msra.mxu0 %v602_v14 }
  0x11   :  { %558 = vmatpush3.bf16.msra.mxu1 %v603_v15  ;;  %537 = vmatprep.subr.bf16.mxu0 %v604_v16 }
  0x12   :  { %559 = vmatprep.subr.bf16.mxu1 %v605_v17 }
  0x14   :  { %538 = vmatpush3.bf16.msra.mxu0 %v606_v18 }
  0x15   :  { %560 = vmatpush3.bf16.msra.mxu1 %v607_v19  ;;  %539 = vmatprep.subr.bf16.mxu0 %v608_v20 }
  0x16   :  { %561 = vmatprep.subr.bf16.mxu1 %v609_v21 }
  0x18   :  { %540 = vmatpush3.bf16.msra.mxu0 %v610_v22 }
  0x19   :  { %562 = vmatpush3.bf16.msra.mxu1 %v611_v23  ;;  %541 = vmatprep.subr.bf16.mxu0 %v612_v24 }
  0x1a   :  { %563 = vmatprep.subr.bf16.mxu1 %v613_v25 }
  0x1c   :  { %542 = vmatpush3.bf16.msra.mxu0 %v614_v26 }
  0x1d   :  { %564 = vmatpush3.bf16.msra.mxu1 %v615_v27  ;;  %543 = vmatprep.subr.bf16.mxu0 %v616_v29 }
  0x1e   :  { %565 = vmatprep.subr.bf16.mxu1 %v617_v30 }
  0x20   :  { %544 = vmatpush3.bf16.msra.mxu0 %v618_v31 }
  0x21   :  { %566 = vmatpush3.bf16.msra.mxu1 %v619_v32 }
  0x22   :  { %10 = vsyncpa [#allocation3], 0  ;;  %v102_v37 = vcombine.high %v492_v34, %v492_v34  ;;  %v105_v38 = vunpack.c.0.s8 %v104_v36  ;;  %v620_v44 = vld [vmem:[%s802_s3 + $0x8] sm:$0xff]   ;;  %v649_v45 = vmov 0.0   ;;  %v621_v46 = vld [vmem:[%s802_s3] sm:$0xff]   ;;  %vm650_vm0 = vmmov 0  }
  0x23   :  { %576 = vmatprep.subr.bf16.mxu0 %v649_v45  ;;  %v491_v49 = vld [vmem:[%s801_s2] ss:$0 sm:$0xff]  ;;  %vm420_vm1 = vcmask 261120   ;;  %vm464_vm2 = vcmask 25600   ;;  %s651_s2 = smov [#allocation2]  }
  0x24   :  { %v108_v39 = vsub.s32 %v105_v38, %v107_v33  ;;  %v525_v62 = vld [vmem:[%s803_s4] ss:$0 sm:$0xff]  ;;  %s483_s4 = sshll.u32 %s651_s2, 4  ;;  %s484_s4 = int_to_ptr.vmem [resolvable:$true] %s483_s4 }
  0x25   :  { %s626_s14 = scalar_lea.vmem %s484_s4, 32  ;;  %p631_p1 = scmp.lt.s32.totalorder %s484_s4, %s484_s4 }
  0x26   :  { %v116_v40 = vrot.slane %v102_v37, %v108_v39  ;;  %v109_v41 = vrot.slane %v492_v34, %v108_v39  ;;  %p627_p0 = scmp.ne.s32.totalorder %s484_s4, %s626_s14  ;;  %p632_p2 = scmp.lt.s32.totalorder %s626_s14, %s626_s14 }
  0x28   :  { %347 = vmatprep.mubr.bf16.mxu0 %v116_v40  ;;  %v118_v42 = vcombine.high %v116_v40, %v116_v40  ;;  %v117_v43 = vcombine.high %v109_v41, %v109_v41  ;;  %p633_p3 = por %p632_p2, %p631_p1 }
  0x29   :  { %348 = vmatmul.mubr.bf16.vlgmr.msra.gmra.mxu0 %v109_v41 }
  0x2a   :  { %387 = vmatprep.mubr.bf16.mxu1 %v118_v42  ;;  %577 = vmatpush3.bf16.msra.mxu0 %v620_v44  ;;  %p634_p4 = pnand %p633_p3, %p627_p0 }
  0x2b   :  { %388 = vmatmul.mubr.bf16.vlgmr.msra.gmra.mxu1 %v117_v43  ;;  %578 = vmatprep.subr.bf16.mxu0 %v649_v45 }
  0x2c   :  { %580 = vmatprep.mubr.msk.bf16.mxu0 %vm650_vm0, %v649_v45 }
  0x2e   :  { %579 = vmatpush3.bf16.msra.mxu0 %v621_v46 }
  0xe9   :  { %v545_v47 = vpop.f32.mrf.mxu0 }
  0xeb   :  { %v567_v48 = vpop.f32.mrf.mxu1  ;;  %v546_v50 = vpop.f32.mrf.mxu0 }
  0xec   :  { %v547_v51 = vadd.f32 %v546_v50, %v545_v47 }
  0xed   :  { %v568_v52 = vpop.f32.mrf.mxu1  ;;  %v548_v53 = vpop.f32.mrf.mxu0 }
  0xee   :  { %v350_v54 = vadd.f32 %v547_v51, %v491_v49  ;;  %v569_v55 = vadd.f32 %v568_v52, %v567_v48 }
  0xef   :  { %v570_v56 = vpop.f32.mrf.mxu1  ;;  %v549_v57 = vpop.f32.mrf.mxu0 }
  0xf0   :  { %v390_v58 = vadd.f32 %v569_v55, %v350_v54 }
  0xf1   :  { %v571_v59 = vpop.f32.mrf.mxu1 }
  0xf2   :  { %v395_v60 = vmax.f32 %v390_v58, 0.0 }
  0xf4   :  { %v396_v61 = vpack.c.bf16 %v395_v60, %v395_v60 }
  0xf6   :  { %581 = vmatmul.mubr.msk.bf16.vlgmr.msra.gmra.mxu0 %vm420_vm1, %v396_v61 }
 0x1b6   :  { %v458_v63 = vpop.f32.mrf.mxu0 }
 0x1b7   :  { %v459_v0 = vadd.f32 %v525_v62, %v458_v63 }
 0x1b8   :  { %v582_v1 = vpop.f32.mrf.mxu0 }
 0x1b9   :  { %v465_v2 = vsel %vm464_vm2, %v459_v0, -inf }
 0x1ba   :  { %466 = vmax.xlane.f32.xlu0 %v465_v2  ;;  %v461_v3 = vpop.f32.mrf.mxu0 }
 0x1bc   :  { %v583_v4 = vpop.f32.mrf.mxu0 }
 0x243   :  { %v467_v5 = vpop.xlane.xlu0 %466 }
 0x244   :  { %v468_v6 = vsub.f32 %v459_v0, %v467_v5 }
 0x246   :  { %v469_v7 = vmul.f32 1.442695, %v468_v6 }
 0x248   :  { %622 = vpow2.f32 %v469_v7 }
 0x255   :  { %v623_v8 = vpop.eup %622 }
 0x256   :  { %v471_v9 = vsel %vm464_vm2, %v623_v8, 0.0 }
 0x257   :  { %472 = vadd.xlane.f32.xlu0 %v471_v9 }
 0x2e0   :  { %v473_v10 = vpop.xlane.xlu0 %472 }
 0x2e1   :  { %624 = vrcp.f32 %v473_v10 }
 0x2ee   :  { %v625_v11 = vpop.eup %624 }
 0x2ef   :  { %v475_v12 = vmul.f32 %v625_v11, %v623_v8 }
 0x2f1   :  { %476 = vst.msk [vmem:[#allocation2] sm:$0x3] %vm464_vm2, %v475_v12 }
 0x2f2   :  { %637 = shalt.err (!%p634_p4)
}
 0x2f3   :  { %486 = dma.vmem_to_hbm [thread:$0]  %s484_s4, 32, %s804_s5, [#allocation3]  }
 0x2f4   :  { %646 = dma.done.wait [#allocation3], 32  }
 0x2f5   :  { %647 = vsyncadd [#allocation3], 4294967264 }
 0x2f6   :  { %490 = vsyncpa [#allocation3], 1 }

</bundles_post_ra>
